<compile_context>
chip_gen: v5e
topology: v5e:2x2
jax: 0.10.0
libtpu: 0.0.40
codegen_flags: <defaults>
</compile_context>

<pallas_src>
import math
from functools import partial

import jax
import jax.numpy as jnp
from jax import lax
from jax.experimental import pallas as pl
from jax.experimental.pallas import tpu as pltpu


# ---------------------------------------------------------------------------
# tiling / compiler-param helpers
# ---------------------------------------------------------------------------
def _pick_lane_tile(dim, pref=512):
    """Tile for a lane (last) dim: full dim if small, else a multiple of 128."""
    if dim <= pref:
        return dim
    for t in (pref, 512, 256, 128):
        if dim % t == 0:
            return t
    # TODO(synk): pad / masked partial blocks (pl.cdiv grid) for ragged lane dims.
    return dim


def _pick_sub_tile(dim, pref=512):
    """Tile for a sublane (second-to-last) dim: full dim if small, else a multiple of 8."""
    if dim <= pref:
        return dim
    for t in (pref, 512, 256, 128, 64, 32, 16, 8):
        if dim % t == 0:
            return t
    # TODO(synk): pad / masked partial blocks for ragged sublane dims.
    return dim


def _mosaic_params(semantics, block_bytes, scratch_bytes=0):
    """CompilerParams with a VMEM limit sized from the actual block footprint."""
    vmem = 2 * (2 * block_bytes + scratch_bytes) + (2 << 20)  # dbl-buffered blocks + headroom
    vmem = int(min(max(vmem, 16 << 20), 64 << 20))            # stay within v7x physical VMEM
    return pltpu.CompilerParams(dimension_semantics=semantics,
                                vmem_limit_bytes=vmem)


# ---------------------------------------------------------------------------
# Kernel 1: fused QKV projection   qkv[r] = x @ Wr + br,  r in {q, k, v}
# ---------------------------------------------------------------------------
def _qkv_proj_kernel(x_ref, w_ref, b_ref, o_ref, acc_ref):
    k = pl.program_id(3)

    @pl.when(k == 0)
    def _():
        acc_ref[...] = jnp.zeros_like(acc_ref)

    acc_ref[...] += jnp.dot(
        x_ref[...].astype(jnp.bfloat16),   # bf16 MXU operands, f32 accumulation
        w_ref[0],                          # weights pre-cast to bf16 at fuse time
        preferred_element_type=jnp.float32,
    )

    @pl.when(k == pl.num_programs(3) - 1)
    def _():
        o_ref[0] = (acc_ref[...] + b_ref[0]).astype(o_ref.dtype)


def pallas_qkv_projection(x2d, wqkv3, bqkv3):
    """x2d (M, D) x wqkv3 (3, D, D) + bqkv3 (3, 1, D) -> (3, M, D) bf16."""
    M, K = x2d.shape
    three, Kw, N = wqkv3.shape
    assert three == 3 and Kw == K
    tm = _pick_sub_tile(M, 512)
    tn = _pick_lane_tile(N, 512)
    tk = _pick_lane_tile(K, 512)
    grid = (3, M // tm, N // tn, K // tk)
    block_bytes = (tm * tk * x2d.dtype.itemsize
                   + tk * tn * wqkv3.dtype.itemsize
                   + tn * bqkv3.dtype.itemsize
                   + tm * tn * 2)
    return pl.pallas_call(
        _qkv_proj_kernel,
        out_shape=jax.ShapeDtypeStruct((3, M, N), jnp.bfloat16),
        grid=grid,
        in_specs=[
            pl.BlockSpec((tm, tk), lambda r, i, j, k: (i, k)),
            pl.BlockSpec((1, tk, tn), lambda r, i, j, k: (r, k, j)),
            pl.BlockSpec((1, 1, tn), lambda r, i, j, k: (r, 0, j)),
        ],
        out_specs=pl.BlockSpec((1, tm, tn), lambda r, i, j, k: (r, i, j)),
        scratch_shapes=[pltpu.VMEM((tm, tn), jnp.float32)],
        compiler_params=_mosaic_params(
            ("parallel", "parallel", "parallel", "arbitrary"),
            block_bytes, tm * tn * 4),
    )(x2d, wqkv3, bqkv3)


# ---------------------------------------------------------------------------
# Kernel 2: flash-style multi-head attention + fused output projection
# ---------------------------------------------------------------------------
def _mha_flash_kernel(q_ref, k_ref, v_ref, mask_ref, wo_ref, bo_ref, o_ref,
                      m_sc, l_sc, acc_sc, *, num_heads):
    ki = pl.program_id(2)

    @pl.when(ki == 0)
    def _():
        m_sc[...] = jnp.full(m_sc.shape, -jnp.inf, dtype=m_sc.dtype)
        l_sc[...] = jnp.zeros(l_sc.shape, l_sc.dtype)
        acc_sc[...] = jnp.zeros(acc_sc.shape, acc_sc.dtype)

    q = q_ref[0, 0]                       # (tq, D) bf16; 1/sqrt(d_k) folded into Wq
    k = k_ref[0, 0]                       # (tk, D) bf16
    v = v_ref[0, 0]                       # (tk, D) bf16
    D = q.shape[-1]
    dk = D // num_heads

    # Additive mask bias, computed ONCE per KV tile (hoisted out of the head loop).
    mvals = mask_ref[0]                   # (1, tk) f32; 1.0 keep / 0.0 masked
    bias = jnp.where(mvals == 0.0, jnp.float32(-1e9), jnp.float32(0.0))

    # TODO(synk): when d_k is a multiple of 128, batch heads into one 3-D contraction
    # instead of this per-head loop (avoids sub-128-lane operand slices).
    for head in range(num_heads):
        lo = head * dk
        qh = q[:, lo:lo + dk]
        kh = k[:, lo:lo + dk]
        vh = v[:, lo:lo + dk]

        # QK^T expressed as a direct contraction (no explicit transpose / XLU work).
        s = lax.dot_general(qh, kh, (((1,), (1,)), ((), ())),
                            preferred_element_type=jnp.float32)     # (tq, tk) f32
        s = s + bias

        # online softmax (all elementwise math kept in f32: v5e-safe)
        m_prev = m_sc[head]
        m_new = jnp.maximum(m_prev, jnp.max(s, axis=-1, keepdims=True))
        alpha = jnp.exp(m_prev - m_new)
        p = jnp.exp(s - m_new)
        l_sc[head] = alpha * l_sc[head] + jnp.sum(p, axis=-1, keepdims=True)
        acc_sc[head] = alpha * acc_sc[head] + jnp.dot(
            p.astype(jnp.bfloat16), vh, preferred_element_type=jnp.float32)
        m_sc[head] = m_new

    @pl.when(ki == pl.num_programs(2) - 1)
    def _():
        # Normalize and apply the output projection, accumulated per head into a
        # lane-dense (tq, D) f32 value (no merged-head scratch, no partial stores).
        out = jnp.zeros(o_ref.shape[1:], jnp.float32)
        for head in range(num_heads):
            ctx = acc_sc[head] * pl.reciprocal(l_sc[head], approx=False)
            out = out + jnp.dot(ctx.astype(jnp.bfloat16), wo_ref[head],
                                preferred_element_type=jnp.float32)
        o_ref[0] = (out + bo_ref[...]).astype(o_ref.dtype)


def pallas_mha(qkv3, mask, wo_h, bo, num_heads, out_dtype):
    """qkv3: (3, B, S, D) bf16; mask: (B, 1, S) f32; wo_h: (h, dk, D) bf16; bo: (1, D)."""
    three, B, S, D = qkv3.shape
    assert three == 3
    h = num_heads
    dk = D // h
    tq = _pick_sub_tile(S, 256)
    tk = _pick_lane_tile(S, 512)
    grid = (B, S // tq, S // tk)
    block_bytes = (tq * D * 2 + 2 * tk * D * 2 + tk * 4 + dk * D * h * 2 + D * 4
                   + tq * D * jnp.dtype(out_dtype).itemsize)
    scratch_bytes = (h * tq * dk + 2 * h * tq) * 4
    return pl.pallas_call(
        partial(_mha_flash_kernel, num_heads=h),
        out_shape=jax.ShapeDtypeStruct((B, S, D), out_dtype),
        grid=grid,
        in_specs=[
            pl.BlockSpec((1, 1, tq, D), lambda b, qi, ki: (0, b, qi, 0)),   # Q tile
            pl.BlockSpec((1, 1, tk, D), lambda b, qi, ki: (1, b, ki, 0)),   # K tile
            pl.BlockSpec((1, 1, tk, D), lambda b, qi, ki: (2, b, ki, 0)),   # V tile
            pl.BlockSpec((1, 1, tk), lambda b, qi, ki: (b, 0, ki)),         # mask tile
            pl.BlockSpec((h, dk, D), lambda b, qi, ki: (0, 0, 0)),          # Wo (per head)
            pl.BlockSpec((1, D), lambda b, qi, ki: (0, 0)),                 # bo
        ],
        out_specs=pl.BlockSpec((1, tq, D), lambda b, qi, ki: (b, qi, 0)),
        scratch_shapes=[
            pltpu.VMEM((h, tq, 1), jnp.float32),    # running max  m
            pltpu.VMEM((h, tq, 1), jnp.float32),    # running sum  l
            pltpu.VMEM((h, tq, dk), jnp.float32),   # running ctx  acc
        ],
        compiler_params=_mosaic_params(
            ("parallel", "parallel", "arbitrary"), block_bytes, scratch_bytes),
    )(qkv3, qkv3, qkv3, mask, wo_h, bo)


# ---------------------------------------------------------------------------
# parameter fusion (done ONCE at init, not per forward call)
# ---------------------------------------------------------------------------
def fuse_params(params, num_heads):
    wq, bq, wk, bk, wv, bv, wo, bo = params
    D = wq.shape[0]
    dk = D // num_heads
    scale = 1.0 / math.sqrt(dk)
    # Fold the softmax 1/sqrt(d_k) into the Q projection; stack Q/K/V weights so the
    # projection kernel emits a (3, ..., D)-shaped output (no sub-128-lane splits later).
    wqkv3 = jnp.stack([wq * scale, wk, wv], axis=0).astype(jnp.bfloat16)   # (3, D, D)
    bqkv3 = jnp.stack([bq * scale, bk, bv], axis=0).reshape(3, 1, D)        # f32
    wo_h = wo.reshape(num_heads, dk, D).astype(jnp.bfloat16)                # (h, dk, D)
    return wqkv3, bqkv3, wo_h, bo.reshape(1, D)


# ---------------------------------------------------------------------------
# EncoderLayer forward
# ---------------------------------------------------------------------------
def encoder_layer_forward(x, mask, fused_params, num_heads):
    """EncoderLayer.forward: self_attn(x, x, x, mask).

    x:    (B, S, D) float32
    mask: (B, 1, S) float32 (1.0 keep, 0.0 masked)
    """
    B, S, D = x.shape
    wqkv3, bqkv3, wo_h, bo = fused_params
    x2d = x.reshape(B * S, D)                                  # contiguous, no copy
    qkv3 = pallas_qkv_projection(x2d, wqkv3, bqkv3)            # (3, B*S, D) bf16
    qkv3 = qkv3.reshape(3, B, S, D)                            # contiguous, no copy
    return pallas_mha(qkv3, mask.astype(jnp.float32), wo_h, bo, num_heads,
                      out_dtype=x.dtype)


# ---------------------------------------------------------------------------
# Pure-JAX f32 reference (sanity check)
# ---------------------------------------------------------------------------
def reference_forward(x, mask, params, num_heads):
    B, S, D = x.shape
    h = num_heads
    dk = D // h
    wq, bq, wk, bk, wv, bv, wo, bo = params
    q = (x @ wq + bq).reshape(B, S, h, dk).transpose(0, 2, 1, 3)
    k = (x @ wk + bk).reshape(B, S, h, dk).transpose(0, 2, 1, 3)
    v = (x @ wv + bv).reshape(B, S, h, dk).transpose(0, 2, 1, 3)
    scores = jnp.einsum("bhqd,bhkd->bhqk", q, k) / math.sqrt(dk)
    m = mask.reshape(B, 1, 1, S)
    scores = jnp.where(m == 0.0, -1e9, scores)
    p = jax.nn.softmax(scores, axis=-1)
    o = jnp.einsum("bhqk,bhkd->bhqd", p, v).transpose(0, 2, 1, 3).reshape(B, S, D)
    return o @ wo + bo


# ---------------------------------------------------------------------------
if __name__ == "__main__":
    B, S, D, H = 2, 8, 32, 4  # batch, seq, d_model, heads

    key = jax.random.PRNGKey(0)
    keys = jax.random.split(key, 10)

    wscale = 1.0 / math.sqrt(D)
    wq = jax.random.normal(keys[0], (D, D), jnp.float32) * wscale
    bq = jax.random.normal(keys[1], (D,), jnp.float32) * 0.01
    wk = jax.random.normal(keys[2], (D, D), jnp.float32) * wscale
    bk = jax.random.normal(keys[3], (D,), jnp.float32) * 0.01
    wv = jax.random.normal(keys[4], (D, D), jnp.float32) * wscale
    bv = jax.random.normal(keys[5], (D,), jnp.float32) * 0.01
    wo = jax.random.normal(keys[6], (D, D), jnp.float32) * wscale
    bo = jax.random.normal(keys[7], (D,), jnp.float32) * 0.01
    params = (wq, bq, wk, bk, wv, bv, wo, bo)
    fused = fuse_params(params, H)            # one-time parameter fusion (not per call)

    x = jax.random.normal(keys[8], (B, S, D), jnp.float32)
    # mask: (B, 1, S) -- mask out the last two key positions of batch 1
    mask = jnp.ones((B, 1, S), jnp.float32)
    mask = mask.at[1, 0, -2:].set(0.0)

    out = jax.block_until_ready(encoder_layer_forward(x, mask, fused, H))
    ref = jax.block_until_ready(reference_forward(x, mask, params, H))

    assert out.shape == (B, S, D)
    # tolerance loosened vs. the pure-f32 version: matmul operands (q/k/v, probs,
    # context, Wqkv, Wo) are now bf16 on the MXU (f32 accumulation), per the perf review.
    err = float(jnp.max(jnp.abs(out - ref)))
    assert err < 1e-1, f"mismatch vs pure-JAX reference: max abs err {err}"

    print("KERNEL_OK")
</pallas_src>

<mosaic_0001>
module attributes {stable_mosaic.version = 11 : i64} {
  func.func @_qkv_proj_kernel(%arg0: i32, %arg1: i32, %arg2: i32, %arg3: i32, %arg4: memref<16x32xf32, #tpu.memory_space<vmem>>, %arg5: memref<1x32x32xbf16, #tpu.memory_space<vmem>>, %arg6: memref<1x1x32xf32, #tpu.memory_space<vmem>>, %arg7: memref<1x16x32xbf16, #tpu.memory_space<vmem>>, %arg8: memref<16x32xf32, #tpu.memory_space<vmem>>) attributes {dimension_semantics = [#tpu.dimension_semantics<parallel>, #tpu.dimension_semantics<parallel>, #tpu.dimension_semantics<parallel>, #tpu.dimension_semantics<arbitrary>], iteration_bounds = array<i64: 3, 1, 1, 1>, scalar_prefetch = 0 : i64, scratch_operands = 1 : i64, tpu.core_type = #tpu.core_type<tc>, window_params = [{transform_indices = @transform_0, window_bounds = array<i64: 16, 32>}, {transform_indices = @transform_1, window_bounds = array<i64: 1, 32, 32>}, {transform_indices = @transform_2, window_bounds = array<i64: 1, 1, 32>}, {transform_indices = @transform_3, window_bounds = array<i64: 1, 16, 32>}]} {
    %c0_i32 = arith.constant 0 : i32
    %0 = arith.cmpi eq, %arg3, %c0_i32 : i32
    %1 = arith.extui %0 : i1 to i32
    %c0_i32_0 = arith.constant 0 : i32
    %2 = arith.cmpi ne, %1, %c0_i32_0 : i32
    scf.if %2 {
      %cst_11 = arith.constant 0.000000e+00 : f32
      %14 = vector.broadcast %cst_11 : f32 to vector<16x32xf32>
      %c0_12 = arith.constant 0 : index
      %c0_13 = arith.constant 0 : index
      %15 = vector.load %arg8[%c0_12, %c0_13] : memref<16x32xf32, #tpu.memory_space<vmem>>, vector<16x32xf32>
      tpu.vector_store %arg8[%c0_12, %c0_13], %14 {strides = array<i32>} : memref<16x32xf32, #tpu.memory_space<vmem>>, vector<16x32xf32>,
    } else {
    }
    %c0 = arith.constant 0 : index
    %c0_1 = arith.constant 0 : index
    %3 = vector.load %arg8[%c0, %c0_1] : memref<16x32xf32, #tpu.memory_space<vmem>>, vector<16x32xf32>
    %c0_2 = arith.constant 0 : index
    %c0_3 = arith.constant 0 : index
    %4 = vector.load %arg4[%c0_2, %c0_3] : memref<16x32xf32, #tpu.memory_space<vmem>>, vector<16x32xf32>
    %5 = arith.truncf %4 : vector<16x32xf32> to vector<16x32xbf16>
    %c0_4 = arith.constant 0 : index
    %c0_5 = arith.constant 0 : index
    %c0_6 = arith.constant 0 : index
    %6 = vector.load %arg5[%c0_4, %c0_5, %c0_6] : memref<1x32x32xbf16, #tpu.memory_space<vmem>>, vector<1x32x32xbf16>
    %7 = vector.shape_cast %6 : vector<1x32x32xbf16> to vector<32x32xbf16>
    %cst = arith.constant dense<0.000000e+00> : vector<16x32xf32>
    %8 = tpu.matmul %5, %7, %cst {dimension_numbers = #tpu.dot_dimension_numbers<[1], [0], [0], [1], [0, 0, 1, 1], [], []>} : vector<16x32xbf16>, vector<32x32xbf16>, vector<16x32xf32> -> vector<16x32xf32>
    %9 = arith.addf %3, %8 : vector<16x32xf32>
    %c0_7 = arith.constant 0 : index
    %c0_8 = arith.constant 0 : index
    %10 = vector.load %arg8[%c0_7, %c0_8] : memref<16x32xf32, #tpu.memory_space<vmem>>, vector<16x32xf32>
    tpu.vector_store %arg8[%c0_7, %c0_8], %9 {strides = array<i32>} : memref<16x32xf32, #tpu.memory_space<vmem>>, vector<16x32xf32>,
    %c0_i32_9 = arith.constant 0 : i32
    %11 = arith.cmpi eq, %arg3, %c0_i32_9 : i32
    %12 = arith.extui %11 : i1 to i32
    %c0_i32_10 = arith.constant 0 : i32
    %13 = arith.cmpi ne, %12, %c0_i32_10 : i32
    scf.if %13 {
      %c0_11 = arith.constant 0 : index
      %c0_12 = arith.constant 0 : index
      %14 = vector.load %arg8[%c0_11, %c0_12] : memref<16x32xf32, #tpu.memory_space<vmem>>, vector<16x32xf32>
      %c0_13 = arith.constant 0 : index
      %c0_14 = arith.constant 0 : index
      %c0_15 = arith.constant 0 : index
      %15 = vector.load %arg6[%c0_13, %c0_14, %c0_15] : memref<1x1x32xf32, #tpu.memory_space<vmem>>, vector<1x1x32xf32>
      %16 = vector.shape_cast %15 : vector<1x1x32xf32> to vector<1x32xf32>
      %17 = vector.broadcast %16 : vector<1x32xf32> to vector<16x32xf32>
      %18 = arith.addf %14, %17 : vector<16x32xf32>
      %19 = arith.truncf %18 : vector<16x32xf32> to vector<16x32xbf16>
      %c0_16 = arith.constant 0 : index
      %c0_17 = arith.constant 0 : index
      %c0_18 = arith.constant 0 : index
      %20 = vector.load %arg7[%c0_16, %c0_17, %c0_18] : memref<1x16x32xbf16, #tpu.memory_space<vmem>>, vector<1x16x32xbf16>
      %21 = vector.shape_cast %20 : vector<1x16x32xbf16> to vector<16x32xbf16>
      %22 = vector.shape_cast %19 : vector<16x32xbf16> to vector<1x16x32xbf16>
      tpu.vector_store %arg7[%c0_16, %c0_17, %c0_18], %22 {strides = array<i32>} : memref<1x16x32xbf16, #tpu.memory_space<vmem>>, vector<1x16x32xbf16>,
    } else {
    }
    return
  }
  func.func @transform_0(%arg0: i32, %arg1: i32, %arg2: i32, %arg3: i32) -> (i32, i32) {
    %c0_i32 = arith.constant 0 : i32
    return %arg1, %arg3 : i32, i32
  }
  func.func @transform_1(%arg0: i32, %arg1: i32, %arg2: i32, %arg3: i32) -> (i32, i32, i32) {
    %c0_i32 = arith.constant 0 : i32
    return %arg0, %arg3, %arg2 : i32, i32, i32
  }
  func.func @transform_2(%arg0: i32, %arg1: i32, %arg2: i32, %arg3: i32) -> (i32, i32, i32) {
    %c0_i32 = arith.constant 0 : i32
    %c0_i32_0 = arith.constant 0 : i32
    return %arg0, %c0_i32, %arg2 : i32, i32, i32
  }
  func.func @transform_3(%arg0: i32, %arg1: i32, %arg2: i32, %arg3: i32) -> (i32, i32, i32) {
    %c0_i32 = arith.constant 0 : i32
    return %arg0, %arg1, %arg2 : i32, i32, i32
  }
}

</mosaic_0001>

<bundles_post_ra>
// kernel: tpu_custom_call.1
= control target key start
LH: loop header
LB: loop body
LE: loop exit
PB: predicated region body
PF: predicated region fallthrough
CT: control target
= control target key end

     0   :  { %8 = vsyncpa [#allocation4], 0  ;;  %s1007_s0 = inlined_call_operand.hbm [shape: f32[16,32], index: 0, kind: input, shape index: {}]   ;;  %s1008_s1 = inlined_call_operand.hbm [shape: bf16[3,32,32], index: 1, kind: input, shape index: {}]   ;;  %s1009_s2 = inlined_call_operand.hbm [shape: f32[3,1,32], index: 2, kind: input, shape index: {}]   ;;  %s1010_s3 = inlined_call_operand.hbm [shape: bf16[3,16,32], index: 3, kind: output, shape index: {}]  }
   0x1   :  { %9 = vsyncpa [#allocation7], 0 }
   0x2   :  { %11 = vsyncpa [#allocation7 + $0x1], 0 }
   0x3   :  { %12 = vsyncpa [#allocation5], 0 }
   0x4   :  { %14 = vsyncpa [#allocation5 + $0x1], 0  ;;  %s830_s12 = smov 0   ;;  %s832_s13 = smov 0  }
   0x5   :  { %s834_s14 = smov 0   ;;  %s836_s15 = smov 0  }
   0x6   :  { %s838_s16 = smov 0   ;;  %s840_s17 = smov 0  }
   0x7 LB: > { %s46_s18 = sadd.s32 1, %s796_s16  ;;  %s85_s19 = sadd.s32 1, %s788_s14  ;;  %s800_s17 = sphi %s840_s17, %s20_s17   ;;  %s796_s16 = sphi %s838_s16, %s1021_s16   ;;  %s792_s15 = sphi %s836_s15, %s1020_s15   ;;  %s788_s14 = sphi %s834_s14, %s1019_s14   ;;  %s784_s13 = sphi %s832_s13, %s1018_s13   ;;  %s780_s12 = sphi %s830_s12, %s1017_s12  }
   0x8   : > { %p48_p0 = scmp.ge.s32.totalorder %s46_s18, 3  ;;  %p92_p1 = scmp.ne.s32.totalorder %s788_s14, %s784_s13 }
   0x9   : > { %p93_p2 = scmp.eq.s32.totalorder %s800_s17, 0  ;;  %p564_p4 = scmp.lt.s32.totalorder %s800_s17, 3 }
   0xa   : > { %s1023_s18 = smov (%p48_p0, %s46_s18), 0  ;;  %s198_s22 = sand.u32 1, %s800_s17  }
   0xb   : > { %p870_p3 = por %p93_p2, %p92_p1  ;;  %s78_s21 = ssub.s32 %s796_s16, %s1023_s18 }
   0xc   : > { %p83_p5 = scmp.eq.s32.totalorder %s78_s21, 0  ;;  %s200_s23 = sand.u32 1, %s788_s14  }
   0xd   : > { %s534_s24 = sshll.u32 %s796_s16, 4  ;;  %s513_s26 = sshll.u32 %s200_s23, 4 }
   0xe   : > { %s881_s25 = scalar_select %p83_p5, %s788_s14, %s85_s19  }
   0xf   : > { %s210_s29 = scalar_lea.hbm %s1008_s1, %s534_s24  ;;  %s202_s4 = scalar_lea.vmem [#allocation6], %s513_s26 }
  0x10   : > { %s211_s30 = sshll.u32 %s210_s29, 4  ;;  %s213_s5 = sshll.u32 %s202_s4, 4  ;;  %s212_s30 = int_to_ptr.hbm [resolvable:$true] %s211_s30  ;;  %s214_s5 = int_to_ptr.vmem [resolvable:$true] %s213_s5 }
  0x11   : > { %p892_p6 = pnand %p564_p4, %p870_p3  ;;  %s896_s7 = scalar_lea.sflag [#allocation7], %s198_s22 }
  0x12   : > { %s802_s8 = smov 64   ;;  %s803_s9 = smov 4  }
  0x13   : > { %555 = dma.hbm_to_vmem [thread:$0]  (!%p892_p6), %s212_s30, 256, %s214_s5, %s896_s7, %s802_s8, %s802_s8, %s803_s9  }
  0x14   : > { %s902_s10 = sadd.s32 4294967295, %s800_s17   ;;  %s509_s11 = sadd.s32 4294967294, %s800_s17  }
  0x15   : > { %p98_p7 = scmp.ne.s32.totalorder %s784_s13, %s780_s12  ;;  %p99_p8 = scmp.eq.s32.totalorder %s902_s10, 0 }
  0x16   : > { %p154_p9 = scmp.eq.s32.totalorder %s902_s10, 2  ;;  %p160_p10 = scmp.eq.s32.totalorder %s509_s11, 2 }
  0x17   : > { %p510_p11 = scmp.ge.s32.totalorder %s800_s17, 1  ;;  %p912_p12 = por %p99_p8, %p98_p7 }
  0x18   : > { %p919_p13 = por %p154_p9, %p92_p1  ;;  %p923_p0 = por %p160_p10, %p98_p7 }
  0x19   : > { %p167_p2 = scmp.lt.s32.totalorder %s800_s17, 4  ;;  %s182_s26 = sshll.u32 %s1007_s0, 4  ;;  %s183_s26 = int_to_ptr.hbm [resolvable:$true] %s182_s26 }
  0x1a   : > { %s804_s28 = smov [#allocation3]   ;;  %s230_s5 = scalar_lea.hbm %s1009_s2, %s796_s16 }
  0x1b   : > { %p931_p3 = pnand %p510_p11, %p167_p2  ;;  %s184_s29 = sshll.u32 %s804_s28, 4  ;;  %s185_s29 = int_to_ptr.vmem [resolvable:$true] %s184_s29 }
  0x1c   : > { %s226_s8 = scalar_lea.vmem [#allocation8], %s200_s23  ;;  %s232_s11 = sshll.u32 %s230_s5, 4  ;;  %s233_s11 = int_to_ptr.hbm [resolvable:$true] %s232_s11 }
  0x1d   : > { %p548_p1 = pneg %p931_p3  ;;  %s234_s9 = sshll.u32 %s226_s8, 4  ;;  %s235_s9 = int_to_ptr.vmem [resolvable:$true] %s234_s9 }
  0x1e   : > { %s805_s22 = smov 128   ;;  %s806_s24 = smov 8  }
  0x1f   : > { %p549_p4 = pnand %p548_p1, %p99_p8  ;;  %243 = sbr.rel (%p931_p3) target bundleno = 201 (0xc9), region = 32 }
  0x20   : > { %558 = dma.hbm_to_vmem [thread:$0]  (!%p892_p6), %s233_s11, 16, %s235_s9, %s896_s7  }
  0x21   : > { %551 = dma.hbm_to_vmem [thread:$0]  (!%p549_p4), %s183_s26, 256, %s185_s29, [#allocation4], %s805_s22, %s805_s22, %s806_s24  }
  0x24   : > { %767 = dma.done.wait (%p99_p8), [#allocation4], 256  }
  0x25   : > { %769 = vsyncadd (%p99_p8), [#allocation4], 4294967040  ;;  %s250_s23 = sand.u32 1, %s902_s10   ;;  %s956_s28 = sand.u32 1, %s784_s13  }
  0x26   : > { %s518_s26 = sshll.u32 %s956_s28, 4  ;;  %s251_s29 = scalar_lea.sflag [#allocation7], %s250_s23 }
  0x27   : > { %s254_s6 = scalar_lea.vmem [#allocation6], %s518_s26 }
  0x28   : > { %771 = dma.done.wait (%p912_p12), %s251_s29, 272  }
  0x29   : > { %773 = vsyncadd (%p912_p12), %s251_s29, 4294967024  ;;  %vm299_vm0 = vcmask 261120   ;;  %v807_v0 = vmov 0.0   ;;  %v536_v1 = vld [vmem:[%s254_s6 + $0x8] sm:$0xff]  ;;  %v535_v2 = vld [vmem:[%s254_s6] sm:$0xff]  ;;  %s263_s7 = scalar_lea.vmem [#allocation8], %s956_s28 }
  0x2a   : > { %300 = vst.msk [vmem:[#allocation2] sm:$0xff] %vm299_vm0, %v807_v0  ;;  %333 = vmatpush.bf16.msra.mxu0 %v536_v1  ;;  %v304_v3 = vld [vmem:[#allocation3] sm:$0xff]  ;;  %v305_v4 = vld [vmem:[#allocation3 + $0x8] sm:$0xff]  ;;  %v623_v10 = vld [vmem:[%s263_s7] ss:$0 sm:$0xff]  ;;  %s519_s10 = sshll.u32 %s956_s28, 3 }
  0x2b   : > { %301 = vst.msk [vmem:[#allocation2 + $0x8] sm:$0xff] %vm299_vm0, %v807_v0  ;;  %v306_v5 = vpack.c.bf16 %v305_v4, %v304_v3  ;;  %s537_s19 = sshll.u32 %s792_s15, 3  ;;  %vm358_vm1 = vcmask 257024   ;;  %s290_s5 = scalar_lea.vmem [#allocation9], %s519_s10 }
  0x2c   : > { %s376_s4 = scalar_lea.hbm %s1010_s3, %s537_s19  ;;  %s377_s8 = sshll.u32 %s290_s5, 4  ;;  %s378_s8 = int_to_ptr.vmem [resolvable:$true] %s377_s8 }
  0x2d   : > { %s379_s9 = sshll.u32 %s376_s4, 4  ;;  %s362_s11 = scalar_lea.sflag [#allocation5], %s956_s28  ;;  %s380_s9 = int_to_ptr.hbm [resolvable:$true] %s379_s9 }
  0x2e   : > { %334 = vmatpush.bf16.msra.mxu0 %v535_v2  ;;  %s728_s22 = sshra.s32 %s380_s9, 4  ;;  %s734_s26 = scalar_lea.hbm %s1010_s3, 24  ;;  %s729_s22 = int_to_ptr.hbm [resolvable:$true] %s728_s22 }
  0x2f   : > { %s730_s15 = scalar_lea.hbm %s729_s22, 8  ;;  %p735_p8 = scmp.lt.s32.totalorder %s729_s22, %s1010_s3 }
  0x30   : > { %p731_p5 = scmp.ne.s32.totalorder %s729_s22, %s730_s15  ;;  %p736_p9 = scmp.lt.s32.totalorder %s734_s26, %s730_s15 }
  0x31   : > { %528 = vmatmul.msk.bf16.vlgmr.msra.gmra.mxu0 %vm299_vm0, %v306_v5  ;;  %v302_v6 = vld [vmem:[#allocation2] sm:$0xff] }
  0x32   : > { %v303_v9 = vld [vmem:[#allocation2 + $0x8] sm:$0xff]  ;;  %p732_p6 = pnand %p731_p5, %p919_p13  ;;  %p737_p10 = por %p736_p9, %p735_p8 }
  0x34   : > { %p733_p7 = pneg %p732_p6 }
  0x36   : > { %p738_p11 = pnand %p737_p10, %p733_p7 }
  0xae   : > { %v336_v7 = vpop.f32.mrf.mxu0 }
  0xaf   : > { %v341_v8 = vadd.f32 %v336_v7, %v302_v6 }
  0xb1   : > { %343 = vst.msk [vmem:[#allocation2] sm:$0xff] %vm299_vm0, %v341_v8 }
  0xb6   : > { %v338_v11 = vpop.f32.mrf.mxu0 }
  0xb7   : > { %v342_v12 = vadd.f32 %v338_v11, %v303_v9 }
  0xb8   : > { %v348_v13 = vld [vmem:[#allocation2] sm:$0xff] }
  0xb9   : > { %344 = vst.msk [vmem:[#allocation2 + $0x8] sm:$0xff] %vm299_vm0, %v342_v12  ;;  %v354_v14 = vadd.f32 %v623_v10, %v348_v13 }
  0xbb   : > { %v356_v15 = vpack.c.bf16 %v354_v14, %v354_v14 }
  0xbd   : > { %359 = vst.msk [vmem:[%s290_s5] sm:$0xf] %vm358_vm1, %v356_v15 }
  0xc0   : > { %v349_v16 = vld [vmem:[#allocation2 + $0x8] sm:$0xff] }
  0xc1   : > { %v355_v17 = vadd.f32 %v623_v10, %v349_v16 }
  0xc3   : > { %v357_v18 = vpack.c.bf16 %v355_v17, %v355_v17 }
  0xc5   : > { %360 = vst.msk [vmem:[%s290_s5 + $0x4] sm:$0xf] %vm358_vm1, %v357_v18 }
  0xc6   : > { %741 = shalt.err (!%p738_p11)
}
  0xc7   : > { %s808_s28 = smov 64   ;;  %s809_s7 = smov 4  }
  0xc8   : > { %546 = dma.vmem_to_hbm [thread:$0]  (%p919_p13), %s378_s8, 128, %s380_s9, %s362_s11, %s808_s28, %s808_s28, %s809_s7  }
  0xc9 PF: > { %p566_p12 = scmp.ge.s32.totalorder %s800_s17, 2  ;;  %s394_s10 = sand.u32 1, %s780_s12  }
  0xca   : > { %s395_s19 = scalar_lea.sflag [#allocation5], %s394_s10 }
  0xcb   : > { %p560_p2 = pnand %p566_p12, %p923_p0 }
  0xcd   : > { %p561_p3 = pneg %p560_p2 }
  0xcf   : > { %775 = dma.done.wait (%p561_p3), %s395_s19, 128  }
  0xd0   : > { %777 = vsyncadd (%p561_p3), %s395_s19, 4294967168  ;;  %s20_s17 = sadd.s32 1, %s800_s17   ;;  %s1017_s12 = smov %s784_s13 }
  0xd1   : > { %p17_p1 = scmp.ge.s32.totalorder %s20_s17, 5   ;;  %s1018_s13 = smov %s788_s14 }
  0xd2   : > { %s1019_s14 = smov %s881_s25  ;;  %s1020_s15 = smov %s796_s16 }
  0xd3   : > { %s1021_s16 = smov %s1023_s18  ;;  %19 = sbr.rel (!%p17_p1) target bundleno = 7 (0x7), region = 102 }
  0xd8   :  { %401 = vsyncpa [#allocation4], 1 }
  0xd9   :  { %403 = vsyncpa [#allocation4 + $0x1], 1 }
  0xda   :  { %404 = vsyncpa [#allocation7], 1 }
  0xdb   :  { %406 = vsyncpa [#allocation7 + $0x1], 1 }
  0xdc   :  { %407 = vsyncpa [#allocation5], 1 }
  0xdd   :  { %409 = vsyncpa [#allocation5 + $0x1], 1 }

</bundles_post_ra>
